<compile_context>
chip_gen: v6e
topology: v6e:2x2x1
jax: 0.10.0
libtpu: 0.0.40
codegen_flags: <defaults>
</compile_context>

<pallas_src>
import functools
import math

import jax
import jax.numpy as jnp
from jax import lax
from jax.experimental import pallas as pl
from jax.experimental.pallas import tpu as pltpu

_LANES = 128
_NPART = 2            # row partitions of the gridded path (one per TC on v7x)
_MAX_BLK_ROWS = 512   # 512x128 block: 256 KiB f32 / 128 KiB bf16 per DMA


def _ceil_to(x, m):
    return -(-x // m) * m


def _cdiv(a, b):
    return -(-a // b)


def _row_align(itemsize):
    # Sublane multiple of the native (8 * 32-bit, 128) tile for this dtype.
    return 8 * max(1, 4 // int(itemsize))


def _default_big_threshold_bytes():
    """Per-loss native-byte size above which the gridded reduction is used."""
    try:
        cap = int(pltpu.get_tpu_info().vmem_capacity_bytes)
    except Exception:
        cap = 64 << 20                      # v7x per-TC VMEM (the smallest)
    # "a few MiB": big enough that the gridless path stays latency-optimal for
    # typical losses, small enough that even v7x never sees a huge VMEM tile.
    return int(min(4 << 20, cap // 8))


# ----------------------------------------------------------------------------
# Kernels
# ----------------------------------------------------------------------------
def _make_packed_sums_kernel(seg_offsets, seg_rows, out_rows):
    """Gridless kernel: one packed (rows, 128) buffer -> per-segment sums."""

    def kernel(x_ref, o_ref):
        sums = [jnp.sum(x_ref[off:off + rows, :].astype(jnp.float32))
                for off, rows in zip(seg_offsets, seg_rows)]
        row = lax.broadcasted_iota(jnp.int32, (out_rows, _LANES), 0)
        out = jnp.zeros((out_rows, _LANES), jnp.float32)
        for j, s in enumerate(sums):
            out = jnp.where(row == j, s, out)
        o_ref[...] = out                     # one unmasked lane-dense store

    return kernel


def _make_blocked_sum_kernel(rows_total, blk, nblk_per_part):
    """Gridded kernel: masked row-block partial sums, one tile per partition."""

    def kernel(x_ref, o_ref, acc_ref):
        p = pl.program_id(0)
        i = pl.program_id(1)

        @pl.when(i == 0)
        def _():
            acc_ref[...] = jnp.zeros_like(acc_ref)

        # Unclamped global row offset of this block: rows beyond the real
        # array (partial tail block / clamped duplicate blocks) are masked.
        base = (p * nblk_per_part + i) * blk
        rid = lax.broadcasted_iota(jnp.int32, (blk, _LANES), 0)
        x = x_ref[...].astype(jnp.float32)
        x = jnp.where(base + rid < rows_total, x, 0.0)
        acc_ref[...] += jnp.sum(x, axis=0, keepdims=True)

        @pl.when(i == nblk_per_part - 1)
        def _():
            o_ref[...] = jnp.broadcast_to(acc_ref[...], (8, _LANES))

    return kernel


# ----------------------------------------------------------------------------
# pallas_call builders
# ----------------------------------------------------------------------------
def _build_packed_call(dtype, seg_offsets, seg_rows, out_rows):
    total_rows = seg_offsets[-1] + seg_rows[-1]
    itemsize = jnp.dtype(dtype).itemsize
    in_bytes = _ceil_to(total_rows, _row_align(itemsize)) * _LANES * itemsize
    out_bytes = out_rows * _LANES * 4
    return pl.pallas_call(
        _make_packed_sums_kernel(seg_offsets, seg_rows, out_rows),
        out_shape=jax.ShapeDtypeStruct((out_rows, _LANES), jnp.float32),
        in_specs=[pl.BlockSpec(memory_space=pltpu.MemorySpace.VMEM)],
        out_specs=pl.BlockSpec(memory_space=pltpu.MemorySpace.VMEM),
        compiler_params=pltpu.CompilerParams(
            # gridless => single-buffered: input + output + small headroom.
            vmem_limit_bytes=int(in_bytes + out_bytes + (2 << 20))),
    )


def _build_blocked_call(dtype, rows_total):
    itemsize = jnp.dtype(dtype).itemsize
    blk = min(_MAX_BLK_ROWS, _ceil_to(rows_total, _row_align(itemsize)))
    nblk_total = _cdiv(rows_total, blk)
    npp = _cdiv(nblk_total, _NPART)          # blocks per partition

    in_spec = pl.BlockSpec(
        (blk, _LANES),
        lambda p, i: (jnp.minimum(p * npp + i, nblk_total - 1), 0))
    out_spec = pl.BlockSpec((8, _LANES), lambda p, i: (p, 0))

    blk_bytes = blk * _LANES * itemsize
    out_bytes = _NPART * 8 * _LANES * 4
    acc_bytes = 8 * _LANES * 4
    vmem_bytes = 2 * blk_bytes + 2 * out_bytes + acc_bytes + (2 << 20)

    return pl.pallas_call(
        _make_blocked_sum_kernel(rows_total, blk, npp),
        out_shape=jax.ShapeDtypeStruct((_NPART * 8, _LANES), jnp.float32),
        grid=(_NPART, npp),
        in_specs=[in_spec],
        out_specs=out_spec,
        scratch_shapes=[pltpu.VMEM((1, _LANES), jnp.float32)],
        compiler_params=pltpu.CompilerParams(
            dimension_semantics=("parallel", "arbitrary"),
            vmem_limit_bytes=int(vmem_bytes)),
    )


# ----------------------------------------------------------------------------
# Aggregation-function builder (cached per static configuration)
# ----------------------------------------------------------------------------
@functools.lru_cache(maxsize=None)
def _build_agg_fn(specs, weights, big_threshold):
    """specs: tuple of ((shape...), dtype_name) per present loss (config order).
    weights: parallel tuple of python floats. big_threshold: bytes."""
    L = len(specs)
    shapes = [s for s, _ in specs]
    dtypes = [jnp.dtype(d) for _, d in specs]
    counts = [int(math.prod(s)) for s in shapes]
    inv_counts = [(1.0 / n) if n > 0 else float("nan") for n in counts]

    # Map loss index -> position among the (non-empty) runtime array args.
    arg_pos, pos = {}, 0
    for i, n in enumerate(counts):
        if n > 0:
            arg_pos[i] = pos
            pos += 1

    small_idx = [i for i, n in enumerate(counts)
                 if 0 < n * dtypes[i].itemsize <= big_threshold]
    big_idx = [i for i, n in enumerate(counts)
               if n * dtypes[i].itemsize > big_threshold]
    # TODO(synk): guard the cumulative size of a packed small-loss group (move
    # members to the gridded path) if a config ever has dozens of MiB-scale
    # "small" losses of the same dtype.

    # ---- per-dtype packed plan for the small losses -------------------------
    small_groups = []        # (idxs, offsets, rows, pallas_call)
    for dt in sorted({dtypes[i].name for i in small_idx}):
        idxs = [i for i in small_idx if dtypes[i].name == dt]
        align = _row_align(jnp.dtype(dt).itemsize)
        offs, rows, off = [], [], 0
        for i in idxs:
            r = _ceil_to(_cdiv(counts[i], _LANES), align)
            offs.append(off)
            rows.append(r)
            off += r
        out_rows = max(8, _ceil_to(len(idxs), 8))
        call = _build_packed_call(jnp.dtype(dt), tuple(offs), tuple(rows),
                                  out_rows)
        small_groups.append((idxs, offs, rows, call))

    # ---- per-loss gridded plan for the big losses ---------------------------
    big_plans = []           # (loss idx, rows_total, pad_elems, pallas_call)
    for i in big_idx:
        n = counts[i]
        pad = (-n) % _LANES
        rows_total = (n + pad) // _LANES
        call = _build_blocked_call(dtypes[i], rows_total)
        big_plans.append((i, rows_total, pad, call))
        # TODO(synk): handle the sub-128 remainder of big losses with in-kernel
        # lane masking to avoid the wrapper-side pad copy when numel % 128 != 0.

    def fn(*arrays):
        sums = {}

        # Small losses: pack per dtype, one gridless kernel per group.
        for idxs, offs, rows, call in small_groups:
            segs = []
            for i, r in zip(idxs, rows):
                flat = arrays[arg_pos[i]].reshape(-1)
                pad = r * _LANES - counts[i]
                if pad:
                    flat = jnp.pad(flat, (0, pad))       # zeros: sum unchanged
                segs.append(flat.reshape(r, _LANES))
            packed = segs[0] if len(segs) == 1 else jnp.concatenate(segs, 0)
            out = call(packed)                            # (out_rows, 128) sums
            for j, i in enumerate(idxs):
                sums[i] = out[j, 0]

        # Big losses: gridded, 2-partition, pipelined block reduction.
        for i, rows_total, pad, call in big_plans:
            flat = arrays[arg_pos[i]].reshape(-1)
            if pad:                                       # only if numel%128 != 0
                flat = jnp.pad(flat, (0, pad))
            out = call(flat.reshape(rows_total, _LANES))  # (NPART*8, 128)
            sums[i] = jnp.sum(out[::8])                   # one row per partition

        # Means + weighted total (config order), all inside the jit.
        means, loss = [], None
        for i in range(L):
            if counts[i] == 0:                            # torch.mean(empty)=NaN
                m = jnp.float32(float("nan"))
            else:
                m = sums[i] * jnp.float32(inv_counts[i])
            means.append(m)
            contrib = m * jnp.float32(weights[i])
            loss = contrib if loss is None else loss + contrib
        return loss, tuple(means)

    return jax.jit(fn)


# ----------------------------------------------------------------------------
# Module
# ----------------------------------------------------------------------------
class LossAggregator:
    """JAX / Pallas port of the PyTorch LossAggregator module."""

    def __init__(self, config, big_threshold_bytes=None):
        self.config = config
        self._big_threshold = int(
            big_threshold_bytes if big_threshold_bytes is not None
            else _default_big_threshold_bytes())

    def __call__(self, loss_dict):
        names, weights, specs, arrays = [], [], [], []
        for loss_name, weight in self.config["weight"].items():
            if loss_name not in loss_dict:
                continue
            x = jnp.asarray(loss_dict[loss_name])
            names.append(loss_name)
            weights.append(float(weight))
            specs.append((tuple(int(d) for d in x.shape),
                          jnp.dtype(x.dtype).name))
            if x.size > 0:                       # empty tensors never hit device
                arrays.append(x)

        if not names:
            return None, {"loss": None}

        fn = _build_agg_fn(tuple(specs), tuple(weights), self._big_threshold)
        loss, means = fn(*arrays)
        loss_aggregated_dict = {name: m for name, m in zip(names, means)}
        loss_aggregated_dict["loss"] = loss
        return loss, loss_aggregated_dict


# ----------------------------------------------------------------------------
# Self-test
# ----------------------------------------------------------------------------
def _reference(config, loss_dict):
    loss, d = None, {}
    for name, w in config["weight"].items():
        if name not in loss_dict:
            continue
        x = jnp.asarray(loss_dict[name]).astype(jnp.float32)
        m = jnp.mean(x) if x.size > 0 else jnp.float32(float("nan"))
        d[name] = m
        loss = m * w if loss is None else loss + m * w
    return loss, d


if __name__ == "__main__":
    key = jax.random.PRNGKey(0)
    k1, k2, k3 = jax.random.split(key, 3)

    loss_dict = {
        "triplet": jax.random.uniform(k1, (2, 4, 16, 16), jnp.float32),
        "softmax": jax.random.uniform(k2, (2, 8), jnp.float32).astype(jnp.bfloat16),
        "center": jax.random.uniform(k3, (2,), jnp.float32),
    }
    config = {
        "weight": {
            "triplet": 1.0,
            "softmax": 0.1,
            "center": 0.003,
            "not_present": 5.0,      # exercises the `continue` branch
        }
    }

    ref_loss, ref_dict = _reference(config, loss_dict)

    def check(agg, tag):
        loss, d = agg(loss_dict)
        jax.block_until_ready(loss)
        assert jnp.allclose(loss, ref_loss, rtol=1e-5, atol=1e-6), (tag, loss, ref_loss)
        for name, m in ref_dict.items():
            assert jnp.allclose(d[name], m, rtol=1e-5, atol=1e-6), (tag, name)

    # 1) Default thresholds -> packed gridless path for the tiny losses.
    check(LossAggregator(config), "small-path")

    # 2) Force the gridded (blocked, 2-partition pipelined) reduction path.
    check(LossAggregator(config, big_threshold_bytes=1), "gridded-path")

    # 3) Empty tensor -> NaN mean and NaN total (torch.mean(empty) semantics).
    cfg_e = {"weight": {"empty": 1.0, "center": 1.0}}
    dict_e_in = {"empty": jnp.zeros((0,), jnp.float32),
                 "center": loss_dict["center"]}
    loss_e, dict_e = LossAggregator(cfg_e)(dict_e_in)
    jax.block_until_ready(loss_e)
    assert bool(jnp.isnan(loss_e)) and bool(jnp.isnan(dict_e["empty"]))
    assert jnp.allclose(dict_e["center"], ref_dict["center"], rtol=1e-5, atol=1e-6)

    print("KERNEL_OK")
</pallas_src>

<mosaic_0001>
module attributes {stable_mosaic.version = 11 : i64} {
  func.func @kernel(%arg0: memref<24x128xf32, #tpu.memory_space<vmem>>, %arg1: memref<8x128xf32, #tpu.memory_space<vmem>>) attributes {dimension_semantics = [], scalar_prefetch = 0 : i64, scratch_operands = 0 : i64, tpu.core_type = #tpu.core_type<tc>} {
    %c0 = arith.constant 0 : index
    %c0_0 = arith.constant 0 : index
    %0 = vector.load %arg0[%c0, %c0_0] : memref<24x128xf32, #tpu.memory_space<vmem>>, vector<16x128xf32>
    %1 = vector.shape_cast %0 : vector<16x128xf32> to vector<1x16x128xf32>
    %cst = arith.constant dense<0.000000e+00> : vector<1xf32>
    %2 = vector.multi_reduction <add>, %1, %cst [1, 2] : vector<1x16x128xf32> to vector<1xf32>
    %3 = vector.shape_cast %2 : vector<1xf32> to vector<1x1x1xf32>
    %4 = vector.extract %3[0, 0, 0] : f32 from vector<1x1x1xf32>
    %c16 = arith.constant 16 : index
    %c0_1 = arith.constant 0 : index
    %5 = vector.load %arg0[%c16, %c0_1] : memref<24x128xf32, #tpu.memory_space<vmem>>, vector<8x128xf32>
    %6 = vector.shape_cast %5 : vector<8x128xf32> to vector<1x8x128xf32>
    %cst_2 = arith.constant dense<0.000000e+00> : vector<1xf32>
    %7 = vector.multi_reduction <add>, %6, %cst_2 [1, 2] : vector<1x8x128xf32> to vector<1xf32>
    %8 = vector.shape_cast %7 : vector<1xf32> to vector<1x1x1xf32>
    %9 = vector.extract %8[0, 0, 0] : f32 from vector<1x1x1xf32>
    %10 = tpu.iota {dimensions = array<i32: 0>} : vector<8x128xi32>
    %cst_3 = arith.constant 0.000000e+00 : f32
    %11 = vector.broadcast %cst_3 : f32 to vector<8x128xf32>
    %c0_i32 = arith.constant 0 : i32
    %12 = vector.broadcast %c0_i32 : i32 to vector<8x128xi32>
    %13 = arith.cmpi eq, %10, %12 : vector<8x128xi32>
    %14 = vector.broadcast %4 : f32 to vector<8x128xf32>
    %15 = arith.select %13, %14, %11 : vector<8x128xi1>, vector<8x128xf32>
    %c1_i32 = arith.constant 1 : i32
    %16 = vector.broadcast %c1_i32 : i32 to vector<8x128xi32>
    %17 = arith.cmpi eq, %10, %16 : vector<8x128xi32>
    %18 = vector.broadcast %9 : f32 to vector<8x128xf32>
    %19 = arith.select %17, %18, %15 : vector<8x128xi1>, vector<8x128xf32>
    %c0_4 = arith.constant 0 : index
    %c0_5 = arith.constant 0 : index
    %20 = vector.load %arg1[%c0_4, %c0_5] : memref<8x128xf32, #tpu.memory_space<vmem>>, vector<8x128xf32>
    tpu.vector_store %arg1[%c0_4, %c0_5], %19 {strides = array<i32>} : memref<8x128xf32, #tpu.memory_space<vmem>>, vector<8x128xf32>,
    return
  }
}

module attributes {stable_mosaic.version = 11 : i64} {
  func.func @kernel(%arg0: memref<16x128xbf16, #tpu.memory_space<vmem>>, %arg1: memref<8x128xf32, #tpu.memory_space<vmem>>) attributes {dimension_semantics = [], scalar_prefetch = 0 : i64, scratch_operands = 0 : i64, tpu.core_type = #tpu.core_type<tc>} {
    %c0 = arith.constant 0 : index
    %c0_0 = arith.constant 0 : index
    %0 = vector.load %arg0[%c0, %c0_0] : memref<16x128xbf16, #tpu.memory_space<vmem>>, vector<16x128xbf16>
    %1 = arith.extf %0 : vector<16x128xbf16> to vector<16x128xf32>
    %2 = vector.shape_cast %1 : vector<16x128xf32> to vector<1x16x128xf32>
    %cst = arith.constant dense<0.000000e+00> : vector<1xf32>
    %3 = vector.multi_reduction <add>, %2, %cst [1, 2] : vector<1x16x128xf32> to vector<1xf32>
    %4 = vector.shape_cast %3 : vector<1xf32> to vector<1x1x1xf32>
    %5 = vector.extract %4[0, 0, 0] : f32 from vector<1x1x1xf32>
    %6 = tpu.iota {dimensions = array<i32: 0>} : vector<8x128xi32>
    %cst_1 = arith.constant 0.000000e+00 : f32
    %7 = vector.broadcast %cst_1 : f32 to vector<8x128xf32>
    %c0_i32 = arith.constant 0 : i32
    %8 = vector.broadcast %c0_i32 : i32 to vector<8x128xi32>
    %9 = arith.cmpi eq, %6, %8 : vector<8x128xi32>
    %10 = vector.broadcast %5 : f32 to vector<8x128xf32>
    %11 = arith.select %9, %10, %7 : vector<8x128xi1>, vector<8x128xf32>
    %c0_2 = arith.constant 0 : index
    %c0_3 = arith.constant 0 : index
    %12 = vector.load %arg1[%c0_2, %c0_3] : memref<8x128xf32, #tpu.memory_space<vmem>>, vector<8x128xf32>
    tpu.vector_store %arg1[%c0_2, %c0_3], %11 {strides = array<i32>} : memref<8x128xf32, #tpu.memory_space<vmem>>, vector<8x128xf32>,
    return
  }
}

</mosaic_0001>

<bundles_post_ra>
// kernel: fn.3
= control target key start
LH: loop header
LB: loop body
LE: loop exit
PB: predicated region body
PF: predicated region fallthrough
CT: control target
= control target key end

     0   :  { %v30_v18 = vlaneseq  ;;  %s69_s0 = inlined_call_operand.vmem [shape: f32[24,128], index: 0, kind: input, shape index: {}]   ;;  %s70_s1 = inlined_call_operand.vmem [shape: f32[8,128], index: 1, kind: output, shape index: {}]  }
   0x1   :  { %v8_v0 = vld [vmem:[%s69_s0] sm:$0xff]  ;;  %v9_v1 = vld [vmem:[%s69_s0 + $0x8] sm:$0xff]  ;;  %v20_v3 = vld [vmem:[%s69_s0 + $0x10] sm:$0xff] }
   0x2   :  { %v10_v2 = vadd.f32 %v9_v1, %v8_v0  ;;  %v31_v19 = vshrl.u32 %v30_v18, 7 }
   0x4   :  { %11 = vadd.xlane.f32.xlu0 %v10_v2  ;;  %vm32_vm0 = vcmp.eq.s32.totalorder %v31_v19, 0  ;;  %vm35_vm1 = vcmp.eq.s32.totalorder %v31_v19, 1 }
   0x8   :  { %21 = vadd.xlane.f32.xlu0 %v20_v3 }
  0x8d   :  { %v12_v4 = vpop.xlane.xlu0 %11 }
  0x8e   :  { %v13_v5 = vrot.slane %v12_v4, 4 }
  0x90   :  { %v14_v6 = vadd.f32 %v13_v5, %v12_v4 }
  0x91   :  { %v22_v7 = vpop.xlane.xlu0 %21 }
  0x92   :  { %v15_v8 = vrot.slane %v14_v6, 2  ;;  %v23_v9 = vrot.slane %v22_v7, 4 }
  0x94   :  { %v24_v10 = vadd.f32 %v23_v9, %v22_v7  ;;  %v16_v11 = vadd.f32 %v15_v8, %v14_v6 }
  0x96   :  { %v25_v12 = vrot.slane %v24_v10, 2  ;;  %v17_v13 = vrot.slane %v16_v11, 1 }
  0x98   :  { %v26_v14 = vadd.f32 %v25_v12, %v24_v10  ;;  %v18_v15 = vadd.f32 %v17_v13, %v16_v11 }
  0x9a   :  { %43 = vpush %v18_v15  ;;  %v27_v16 = vrot.slane %v26_v14, 1 }
  0x9c   :  { %v28_v17 = vadd.f32 %v27_v16, %v26_v14 }
  0x9e   :  { %45 = vpush %v28_v17 }
  0xcb   :  { %s44_s0 = spop %43 }
  0xcc   :  { %v33_v20 = vstv %s44_s0 }
  0xcd   :  { %v34_v21 = vsel %vm32_vm0, %v33_v20, 0.0 }
  0xcf   :  { %s46_s12 = spop %45 }
  0xd0   :  { %v36_v22 = vstv %s46_s12 }
  0xd1   :  { %v37_v23 = vsel %vm35_vm1, %v36_v22, %v34_v21 }
  0xd2   :  { %38 = vst [vmem:[%s70_s1] sm:$0xff] %v37_v23 }

// kernel: fn.2
= control target key start
LH: loop header
LB: loop body
LE: loop exit
PB: predicated region body
PF: predicated region fallthrough
CT: control target
= control target key end

     0   :  { %v22_v11 = vlaneseq  ;;  %s54_s0 = inlined_call_operand.vmem [shape: bf16[16,128], index: 0, kind: input, shape index: {}]   ;;  %s55_s1 = inlined_call_operand.vmem [shape: f32[8,128], index: 1, kind: output, shape index: {}]  }
   0x1   :  { %v33_v0 = vld [vmem:[%s54_s0] sm:$0xff]  }
   0x2   :  { %v34_v1 = vunpack.c.l.bf16 %v33_v0  ;;  %v35_v2 = vunpack.c.h.bf16 %v33_v0  ;;  %v23_v12 = vshrl.u32 %v22_v11, 7 }
   0x4   :  { %v12_v3 = vadd.f32 %v35_v2, %v34_v1  ;;  %vm24_vm0 = vcmp.eq.s32.totalorder %v23_v12, 0 }
   0x6   :  { %13 = vadd.xlane.f32.xlu0 %v12_v3 }
  0x8f   :  { %v14_v4 = vpop.xlane.xlu0 %13 }
  0x90   :  { %v15_v5 = vrot.slane %v14_v4, 4 }
  0x92   :  { %v16_v6 = vadd.f32 %v15_v5, %v14_v4 }
  0x94   :  { %v17_v7 = vrot.slane %v16_v6, 2 }
  0x96   :  { %v18_v8 = vadd.f32 %v17_v7, %v16_v6 }
  0x98   :  { %v19_v9 = vrot.slane %v18_v8, 1 }
  0x9a   :  { %v20_v10 = vadd.f32 %v19_v9, %v18_v8 }
  0x9c   :  { %36 = vpush %v20_v10 }
  0xcd   :  { %s37_s8 = spop %36 }
  0xce   :  { %v25_v13 = vstv %s37_s8 }
  0xcf   :  { %v26_v14 = vsel %vm24_vm0, %v25_v13, 0.0 }
  0xd0   :  { %27 = vst [vmem:[%s55_s1] sm:$0xff] %v26_v14 }

</bundles_post_ra>
